<compile_context>
chip_gen: v7x
topology: tpu7x:2x2x1
jax: 0.10.0
libtpu: 0.0.40
codegen_flags: <defaults>
</compile_context>

<pallas_src>
import functools

import jax
import jax.numpy as jnp
from jax.experimental import pallas as pl
from jax.experimental.pallas import tpu as pltpu


def _mask_build_kernel(w_full_ref, w_dup_ref, r_dup_ref, m_ref, *,
                       pmask_slope, sample_slope, sparsity):
    # w_full_ref: (1, 2*H*W) full logit weights (both channels) -- for the global mean
    # w_dup_ref : (1, 2*H*W) channel-0 logit weights duplicated into the interleaved layout
    # r_dup_ref : (1, 2*H*W) channel-0 uniform(0,1) noise duplicated likewise
    # m_ref     : (1, 2*H*W) output: interleaved multiplicative mask (same value re/im)
    pmask_full = jax.nn.sigmoid(pmask_slope * w_full_ref[...])
    xbar = jnp.mean(pmask_full)                      # mean over BOTH channels (global)
    r = sparsity / xbar
    beta = (1.0 - sparsity) / (1.0 - xbar)
    le = (r <= 1.0).astype(jnp.float32)
    pmask0 = jax.nn.sigmoid(pmask_slope * w_dup_ref[...])
    sparse0 = le * pmask0 * r + (1.0 - le) * (1.0 - (1.0 - pmask0) * beta)
    m_ref[...] = jax.nn.sigmoid(sample_slope * (sparse0 - r_dup_ref[...]))


def _apply_mask_kernel(m_ref, x_ref, o_ref):
    # m_ref: (1, HW2) f32 ; x_ref/o_ref: (bt, HW2) in x's dtype
    o_ref[...] = (x_ref[...] * m_ref[...]).astype(o_ref.dtype)


def _pick_batch_tile(B, row_bytes):
    """Batch rows per block: multiple of 8 (or full B), ~4 MiB per block."""
    if B % 8 != 0:
        return B                                     # small/ragged batch: single block
    target = max(8, ((4 << 20) // row_bytes) // 8 * 8)
    bt = min(B, target)
    while B % bt != 0:
        bt -= 8
    if B // bt == 1 and B >= 16:                     # >=2 grid steps so both v7x TCs get work
        bt = max(8, (B // 2) // 8 * 8)
        while B % bt != 0:
            bt -= 8
    return bt


def mask_forward(x, weight, rand0, *, pmask_slope, sample_slope, sparsity):
    """x: (B, H, W, 2), weight: (H, W, 2), rand0: (H, W).  Returns (B, H, W, 2)."""
    B, H, W, C = x.shape
    assert C == 2 and weight.shape == (H, W, 2) and rand0.shape == (H, W)
    HW2 = H * W * 2

    # B-independent layout plumbing on tiny (H, W, 2) tensors only; the big
    # activation tensor is never transposed or copied outside the kernel.
    w_full = weight.astype(jnp.float32).reshape(1, HW2)
    w_dup = jnp.broadcast_to(weight[..., :1], (H, W, 2)).astype(jnp.float32).reshape(1, HW2)
    r_dup = jnp.broadcast_to(rand0[..., None], (H, W, 2)).astype(jnp.float32).reshape(1, HW2)

    build = functools.partial(
        _mask_build_kernel,
        pmask_slope=float(pmask_slope),
        sample_slope=float(sample_slope),
        sparsity=float(sparsity),
    )

    # One-shot mask kernel (hoisted out of the batch loop).
    mask = pl.pallas_call(
        build,
        out_shape=jax.ShapeDtypeStruct((1, HW2), jnp.float32),
        grid=(1,),
        in_specs=[
            pl.BlockSpec((1, HW2), lambda i: (0, 0)),
            pl.BlockSpec((1, HW2), lambda i: (0, 0)),
            pl.BlockSpec((1, HW2), lambda i: (0, 0)),
        ],
        out_specs=pl.BlockSpec((1, HW2), lambda i: (0, 0)),
    )(w_full, w_dup, r_dup)

    # Apply kernel: lane-dense, batch-tiled element-wise multiply.
    x_flat = x.reshape(B, HW2)                        # free contiguous reshape
    row_bytes = HW2 * x_flat.dtype.itemsize
    bt = _pick_batch_tile(B, row_bytes)

    out_flat = pl.pallas_call(
        _apply_mask_kernel,
        out_shape=jax.ShapeDtypeStruct((B, HW2), x.dtype),
        grid_spec=pltpu.PrefetchScalarGridSpec(
            num_scalar_prefetch=0,
            grid=(B // bt,),
            in_specs=[
                pl.BlockSpec((1, HW2), lambda i: (0, 0)),    # grid-invariant mask
                pl.BlockSpec((bt, HW2), lambda i: (i, 0)),
            ],
            out_specs=pl.BlockSpec((bt, HW2), lambda i: (i, 0)),
        ),
        compiler_params=pltpu.CompilerParams(dimension_semantics=("parallel",)),
    )(mask, x_flat)

    return out_flat.reshape(B, H, W, 2)


def _reference(x, weight, rand0, *, pmask_slope, sample_slope, sparsity):
    pmask = jax.nn.sigmoid(pmask_slope * weight)
    xbar = jnp.mean(pmask)
    r = sparsity / xbar
    beta = (1.0 - sparsity) / (1.0 - xbar)
    le = (r <= 1.0).astype(jnp.float32)
    sparse = le * pmask * r + (1.0 - le) * (1.0 - (1.0 - pmask) * beta)
    mask0 = jax.nn.sigmoid(sample_slope * (sparse[:, :, 0] - rand0))
    return x * mask0[None, :, :, None]


if __name__ == "__main__":
    # module config
    H, W = 16, 16
    B = 2
    pmask_slope = 5.0
    sample_slope = 10.0
    sparsity = 0.25
    eps = 0.01

    key = jax.random.PRNGKey(0)
    k_w, k_r, k_x = jax.random.split(key, 3)

    # deterministic parameter init, matching the PyTorch __init__:
    #   weight ~ U(eps, 1-eps); weight = -log(1/weight - 1) / pmask_slope
    w0 = jax.random.uniform(k_w, (H, W, 2), jnp.float32, minval=eps, maxval=1.0 - eps)
    weight = -jnp.log(1.0 / w0 - 1.0) / pmask_slope

    # threshold() draws uniform(0,1) noise; only channel 0 ever affects the output.
    # TODO(synk): PyTorch draws this inside forward(); sampled here in plain JAX for determinism.
    rand0 = jax.random.uniform(k_r, (H, W), jnp.float32)

    x = jax.random.normal(k_x, (B, H, W, 2), jnp.float32)

    out = mask_forward(
        x, weight, rand0,
        pmask_slope=pmask_slope, sample_slope=sample_slope, sparsity=sparsity,
    )
    out = jax.block_until_ready(out)

    ref = _reference(
        x, weight, rand0,
        pmask_slope=pmask_slope, sample_slope=sample_slope, sparsity=sparsity,
    )
    assert out.shape == x.shape and out.dtype == x.dtype
    assert jnp.allclose(out, ref, atol=1e-5, rtol=1e-5)

    print("KERNEL_OK")
</pallas_src>

<mosaic_0001>
module attributes {stable_mosaic.version = 11 : i64} {
  func.func @_mask_build_kernel(%arg0: i32, %arg1: memref<1x512xf32, #tpu.memory_space<vmem>>, %arg2: memref<1x512xf32, #tpu.memory_space<vmem>>, %arg3: memref<1x512xf32, #tpu.memory_space<vmem>>, %arg4: memref<1x512xf32, #tpu.memory_space<vmem>>) attributes {dimension_semantics = [#tpu.dimension_semantics<arbitrary>], iteration_bounds = array<i64: 1>, scalar_prefetch = 0 : i64, scratch_operands = 0 : i64, tpu.core_type = #tpu.core_type<tc>, window_params = [{pipeline_mode = #tpu.pipeline_mode<synchronous>, transform_indices = @transform_0, window_bounds = array<i64: 1, 512>}, {pipeline_mode = #tpu.pipeline_mode<synchronous>, transform_indices = @transform_1, window_bounds = array<i64: 1, 512>}, {pipeline_mode = #tpu.pipeline_mode<synchronous>, transform_indices = @transform_2, window_bounds = array<i64: 1, 512>}, {pipeline_mode = #tpu.pipeline_mode<synchronous>, transform_indices = @transform_3, window_bounds = array<i64: 1, 512>}]} {
    %c0 = arith.constant 0 : index
    %c0_0 = arith.constant 0 : index
    %0 = vector.load %arg1[%c0, %c0_0] : memref<1x512xf32, #tpu.memory_space<vmem>>, vector<1x512xf32>
    %cst = arith.constant 5.000000e+00 : f32
    %1 = vector.broadcast %cst : f32 to vector<1x512xf32>
    %2 = arith.mulf %1, %0 : vector<1x512xf32>
    %3 = arith.negf %2 : vector<1x512xf32>
    %4 = math.exp %3 : vector<1x512xf32>
    %cst_1 = arith.constant 1.000000e+00 : f32
    %5 = vector.broadcast %cst_1 : f32 to vector<1x512xf32>
    %6 = arith.addf %5, %4 : vector<1x512xf32>
    %7 = arith.divf %5, %6 : vector<1x512xf32>
    %8 = vector.shape_cast %7 : vector<1x512xf32> to vector<1x1x512xf32>
    %cst_2 = arith.constant dense<0.000000e+00> : vector<1xf32>
    %9 = vector.multi_reduction <add>, %8, %cst_2 [1, 2] : vector<1x1x512xf32> to vector<1xf32>
    %10 = vector.shape_cast %9 : vector<1xf32> to vector<1x1x1xf32>
    %11 = vector.extract %10[0, 0, 0] : f32 from vector<1x1x1xf32>
    %cst_3 = arith.constant 5.120000e+02 : f32
    %12 = arith.divf %11, %cst_3 : f32
    %cst_4 = arith.constant 2.500000e-01 : f32
    %13 = arith.divf %cst_4, %12 : f32
    %cst_5 = arith.constant 1.000000e+00 : f32
    %14 = arith.subf %cst_5, %12 : f32
    %cst_6 = arith.constant 7.500000e-01 : f32
    %15 = arith.divf %cst_6, %14 : f32
    %cst_7 = arith.constant 1.000000e+00 : f32
    %16 = arith.cmpf ole, %13, %cst_7 : f32
    %17 = arith.extui %16 : i1 to i32
    %18 = arith.sitofp %17 : i32 to f32
    %c0_8 = arith.constant 0 : index
    %c0_9 = arith.constant 0 : index
    %19 = vector.load %arg2[%c0_8, %c0_9] : memref<1x512xf32, #tpu.memory_space<vmem>>, vector<1x512xf32>
    %cst_10 = arith.constant 5.000000e+00 : f32
    %20 = vector.broadcast %cst_10 : f32 to vector<1x512xf32>
    %21 = arith.mulf %20, %19 : vector<1x512xf32>
    %22 = arith.negf %21 : vector<1x512xf32>
    %23 = math.exp %22 : vector<1x512xf32>
    %cst_11 = arith.constant 1.000000e+00 : f32
    %24 = vector.broadcast %cst_11 : f32 to vector<1x512xf32>
    %25 = arith.addf %24, %23 : vector<1x512xf32>
    %26 = arith.divf %24, %25 : vector<1x512xf32>
    %27 = vector.broadcast %18 : f32 to vector<1x512xf32>
    %28 = arith.mulf %27, %26 : vector<1x512xf32>
    %29 = vector.broadcast %13 : f32 to vector<1x512xf32>
    %30 = arith.mulf %28, %29 : vector<1x512xf32>
    %cst_12 = arith.constant 1.000000e+00 : f32
    %31 = arith.subf %cst_12, %18 : f32
    %cst_13 = arith.constant 1.000000e+00 : f32
    %32 = vector.broadcast %cst_13 : f32 to vector<1x512xf32>
    %33 = arith.subf %32, %26 : vector<1x512xf32>
    %34 = vector.broadcast %15 : f32 to vector<1x512xf32>
    %35 = arith.mulf %33, %34 : vector<1x512xf32>
    %cst_14 = arith.constant 1.000000e+00 : f32
    %36 = vector.broadcast %cst_14 : f32 to vector<1x512xf32>
    %37 = arith.subf %36, %35 : vector<1x512xf32>
    %38 = vector.broadcast %31 : f32 to vector<1x512xf32>
    %39 = arith.mulf %38, %37 : vector<1x512xf32>
    %40 = arith.addf %30, %39 : vector<1x512xf32>
    %c0_15 = arith.constant 0 : index
    %c0_16 = arith.constant 0 : index
    %41 = vector.load %arg3[%c0_15, %c0_16] : memref<1x512xf32, #tpu.memory_space<vmem>>, vector<1x512xf32>
    %42 = arith.subf %40, %41 : vector<1x512xf32>
    %cst_17 = arith.constant 1.000000e+01 : f32
    %43 = vector.broadcast %cst_17 : f32 to vector<1x512xf32>
    %44 = arith.mulf %43, %42 : vector<1x512xf32>
    %45 = arith.negf %44 : vector<1x512xf32>
    %46 = math.exp %45 : vector<1x512xf32>
    %cst_18 = arith.constant 1.000000e+00 : f32
    %47 = vector.broadcast %cst_18 : f32 to vector<1x512xf32>
    %48 = arith.addf %47, %46 : vector<1x512xf32>
    %49 = arith.divf %47, %48 : vector<1x512xf32>
    %c0_19 = arith.constant 0 : index
    %c0_20 = arith.constant 0 : index
    %50 = vector.load %arg4[%c0_19, %c0_20] : memref<1x512xf32, #tpu.memory_space<vmem>>, vector<1x512xf32>
    tpu.vector_store %arg4[%c0_19, %c0_20], %49 {strides = array<i32>} : memref<1x512xf32, #tpu.memory_space<vmem>>, vector<1x512xf32>,
    return
  }
  func.func @transform_0(%arg0: i32) -> (i32, i32) {
    %c0_i32 = arith.constant 0 : i32
    %c0_i32_0 = arith.constant 0 : i32
    %c0_i32_1 = arith.constant 0 : i32
    return %c0_i32, %c0_i32_0 : i32, i32
  }
  func.func @transform_1(%arg0: i32) -> (i32, i32) {
    %c0_i32 = arith.constant 0 : i32
    %c0_i32_0 = arith.constant 0 : i32
    %c0_i32_1 = arith.constant 0 : i32
    return %c0_i32, %c0_i32_0 : i32, i32
  }
  func.func @transform_2(%arg0: i32) -> (i32, i32) {
    %c0_i32 = arith.constant 0 : i32
    %c0_i32_0 = arith.constant 0 : i32
    %c0_i32_1 = arith.constant 0 : i32
    return %c0_i32, %c0_i32_0 : i32, i32
  }
  func.func @transform_3(%arg0: i32) -> (i32, i32) {
    %c0_i32 = arith.constant 0 : i32
    %c0_i32_0 = arith.constant 0 : i32
    %c0_i32_1 = arith.constant 0 : i32
    return %c0_i32, %c0_i32_0 : i32, i32
  }
}

</mosaic_0001>

<bundles_post_ra>
// kernel: tpu_custom_call.1
= control target key start
LH: loop header
LB: loop body
LE: loop exit
PB: predicated region body
PF: predicated region fallthrough
CT: control target
= control target key end

     0   :  { %8 = vsyncpa [#allocation3], 0  ;;  %s314_s0 = inlined_call_operand.hbm [shape: f32[1,512], index: 0, kind: input, shape index: {}]   ;;  %s315_s1 = inlined_call_operand.hbm [shape: f32[1,512], index: 1, kind: input, shape index: {}]   ;;  %s316_s2 = inlined_call_operand.vmem [shape: f32[1,512], index: 2, kind: input, shape index: {}]   ;;  %s317_s3 = inlined_call_operand.hbm [shape: f32[1,512], index: 3, kind: output, shape index: {}]  }
   0x1   :  { %9 = vsyncpa [#allocation6], 0 }
   0x2   :  { %10 = vsyncpa [#allocation4], 0  ;;  %s250_s12 = smov [#allocation2]   ;;  %s251_s14 = smov [#allocation5]  }
   0x3   :  { %s17_s13 = sshll.u32 %s250_s12, 4  ;;  %s27_s15 = sshll.u32 %s251_s14, 4  ;;  %s18_s13 = int_to_ptr.vmem [resolvable:$true] %s17_s13  ;;  %s28_s15 = int_to_ptr.vmem [resolvable:$true] %s27_s15 }
   0x4   :  { %s178_s18 = scalar_lea.hbm %s314_s0, 64 }
   0x5   :  { %p179_p0 = scmp.ne.s32.totalorder %s314_s0, %s178_s18  ;;  %p182_p1 = scmp.lt.u32.totalorder %s178_s18, %s314_s0 }
   0x7   :  { %p184_p2 = pnand %p182_p1, %p179_p0 }
   0x9   :  { %187 = shalt.err (!%p184_p2)
}
   0xa   :  { %s188_s23 = scalar_lea.vmem %s18_s13, 64  ;;  %p193_p4 = scmp.lt.s32.totalorder %s18_s13, %s18_s13 }
   0xb   :  { %p189_p3 = scmp.ne.s32.totalorder %s18_s13, %s188_s23  ;;  %p194_p5 = scmp.lt.s32.totalorder %s188_s23, %s188_s23 }
   0xd   :  { %p195_p6 = por %p194_p5, %p193_p4 }
   0xf   :  { %p196_p7 = pnand %p195_p6, %p189_p3 }
  0x11   :  { %199 = shalt.err (!%p196_p7)
}
  0x12   :  { %20 = dma.hbm_to_vmem [thread:$0]  %s314_s0, 64, %s18_s13, [#allocation3]  }
  0x13   :  { %s200_s28 = scalar_lea.hbm %s315_s1, 64 }
  0x14   :  { %p201_p8 = scmp.ne.s32.totalorder %s315_s1, %s200_s28  ;;  %p204_p9 = scmp.lt.u32.totalorder %s200_s28, %s315_s1 }
  0x16   :  { %p206_p10 = pnand %p204_p9, %p201_p8 }
  0x18   :  { %209 = shalt.err (!%p206_p10)
}
  0x19   :  { %s210_s6 = scalar_lea.vmem %s28_s15, 64  ;;  %p215_p12 = scmp.lt.s32.totalorder %s28_s15, %s28_s15 }
  0x1a   :  { %p211_p11 = scmp.ne.s32.totalorder %s28_s15, %s210_s6  ;;  %p216_p13 = scmp.lt.s32.totalorder %s210_s6, %s210_s6 }
  0x1c   :  { %p217_p0 = por %p216_p13, %p215_p12 }
  0x1e   :  { %p218_p1 = pnand %p217_p0, %p211_p11 }
  0x20   :  { %221 = shalt.err (!%p218_p1)
}
  0x21   :  { %30 = dma.hbm_to_vmem [thread:$0]  %s315_s1, 64, %s28_s15, [#allocation6]  }
  0x22   :  { %244 = dma.done.wait [#allocation3], 64  }
  0x23   :  { %245 = vsyncadd [#allocation3], 4294967232 }
  0x24   :  { %246 = dma.done.wait [#allocation6], 64  }
  0x25   :  { %247 = vsyncadd [#allocation6], 4294967232  ;;  %v39_v0 = vld [vmem:[#allocation2] sm:$0xf]  ;;  %v48_v5 = vlaneseq  ;;  %vm68_vm0 = vcmask 1040384   ;;  %s252_s19 = smov [#allocation7]  }
  0x26   :  { %v150_v1 = vmul.f32 -5.0, %v39_v0  ;;  %v100_v34 = vld [vmem:[#allocation5] sm:$0xf]  ;;  %v120_v50 = vld [vmem:[%s316_s2] sm:$0xf]  ;;  %s140_s20 = sshll.u32 %s252_s19, 4  ;;  %s141_s20 = int_to_ptr.vmem [resolvable:$true] %s140_s20 }
  0x27   :  { %v49_v6 = vshrl.u32 %v48_v5, 7  ;;  %v151_v35 = vmul.f32 -5.0, %v100_v34  ;;  %vm131_vm1 = vcmp.lt.s32.totalorder %v48_v5, 512  ;;  %s222_s21 = scalar_lea.vmem %s141_s20, 64  ;;  %p227_p4 = scmp.lt.s32.totalorder %s141_s20, %s141_s20 }
  0x28   :  { %v42_v2 = vmul.f32 1.442695, %v150_v1  ;;  %p223_p3 = scmp.ne.s32.totalorder %s141_s20, %s222_s21  ;;  %p228_p5 = scmp.lt.s32.totalorder %s222_s21, %s222_s21 }
  0x29   :  { %v50_v7 = vsub.s32 0, %v49_v6  ;;  %v54_v8 = vsub.s32 1, %v49_v6  ;;  %v58_v9 = vsub.s32 2, %v49_v6  ;;  %v62_v10 = vsub.s32 3, %v49_v6 }
  0x2a   :  { %162 = vpow2.f32 %v42_v2  ;;  %v103_v36 = vmul.f32 1.442695, %v151_v35  ;;  %p229_p6 = por %p228_p5, %p227_p4 }
  0x2c   :  { %p230_p7 = pnand %p229_p6, %p223_p3 }
  0x34   :  { %v163_v3 = vpop.eup %162 }
  0x35   :  { %v44_v4 = vadd.f32 1.0, %v163_v3 }
  0x37   :  { %164 = vrcp.f32 %v44_v4 }
  0x41   :  { %v165_v11 = vpop.eup %164 }
  0x42   :  { %v51_v12 = vrot.slane %v165_v11, %v50_v7  ;;  %v55_v13 = vrot.slane %v165_v11, %v54_v8  ;;  %v59_v14 = vrot.slane %v165_v11, %v58_v9  ;;  %v63_v15 = vrot.slane %v165_v11, %v62_v10 }
  0x44   :  { %v69_v16 = vsel %vm68_vm0, %v51_v12, 0.0  ;;  %v70_v17 = vsel %vm68_vm0, %v55_v13, 0.0  ;;  %v72_v18 = vsel %vm68_vm0, %v59_v14, 0.0  ;;  %v74_v20 = vsel %vm68_vm0, %v63_v15, 0.0 }
  0x45   :  { %v71_v19 = vadd.f32 %v70_v17, %v69_v16 }
  0x47   :  { %v73_v21 = vadd.f32 %v72_v18, %v71_v19 }
  0x49   :  { %v75_v22 = vadd.f32 %v74_v20, %v73_v21 }
  0x4b   :  { %76 = vadd.xlane.f32.xlu0 %v75_v22 }
  0xd8   :  { %v77_v23 = vpop.xlane.xlu0 %76 }
  0xd9   :  { %v78_v24 = vrot.slane %v77_v23, 4 }
  0xdb   :  { %v79_v25 = vadd.f32 %v78_v24, %v77_v23 }
  0xdd   :  { %v80_v26 = vrot.slane %v79_v25, 2 }
  0xdf   :  { %v81_v27 = vadd.f32 %v80_v26, %v79_v25 }
  0xe1   :  { %v82_v28 = vrot.slane %v81_v27, 1 }
  0xe3   :  { %v83_v29 = vadd.f32 %v82_v28, %v81_v27 }
  0xe5   :  { %153 = vpush %v83_v29 }
 0x116   :  { %s154_s1 = spop %153 }
 0x117   :  { %s87_s8 = smul.f32 0.001953125, %s154_s1 }
 0x119   :  { %v88_v30 = vstv %s87_s8  ;;  %s92_s9 = ssub.f32 1.0, %s87_s8 }
 0x11a   :  { %166 = vrcp.f32 %v88_v30 }
 0x11b   :  { %v93_v31 = vstv %s92_s9 }
 0x11c   :  { %168 = vrcp.f32 %v93_v31 }
 0x11d   :  { %170 = vpow2.f32 %v103_v36 }
 0x124   :  { %v167_v32 = vpop.eup %166 }
 0x125   :  { %155 = vpush %v167_v32 }
 0x126   :  { %v169_v33 = vpop.eup %168 }
 0x127   :  { %157 = vpush %v169_v33  ;;  %v171_v37 = vpop.eup %170 }
 0x128   :  { %v105_v38 = vadd.f32 1.0, %v171_v37 }
 0x12a   :  { %172 = vrcp.f32 %v105_v38 }
 0x134   :  { %v173_v39 = vpop.eup %172 }
 0x135   :  { %v113_v40 = vsub.f32 1.0, %v173_v39 }
 0x156   :  { %s156_s10 = spop %155 }
 0x157   :  { %s91_s11 = smul.f32 0.25, %s156_s10 }
 0x158   :  { %s158_s12 = spop %157 }
 0x159   :  { %p97_p2 = scmp.le.f32.partialorder %s91_s11, 1.0  ;;  %s96_s13 = smul.f32 0.75, %s158_s12  ;;  %v110_v46 = vstv %s91_s11 }
 0x15b   :  { %s98_s14 = scalar_select %p97_p2, 1, 0  ;;  %v114_v41 = vstv %s96_s13 }
 0x15c   :  { %v115_v42 = vmul.f32 %v114_v41, %v113_v40 }
 0x15d   :  { %s99_s15 = scvt.s32.f32 %s98_s14 }
 0x15e   :  { %v116_v45 = vsub.f32 1.0, %v115_v42 }
 0x15f   :  { %v108_v43 = vstv %s99_s15  ;;  %s112_s16 = ssub.f32 1.0, %s99_s15 }
 0x160   :  { %v109_v44 = vmul.f32 %v173_v39, %v108_v43 }
 0x161   :  { %v117_v47 = vstv %s112_s16 }
 0x162   :  { %v111_v48 = vmul.f32 %v110_v46, %v109_v44  ;;  %v118_v49 = vmul.f32 %v117_v47, %v116_v45 }
 0x164   :  { %v119_v51 = vadd.f32 %v118_v49, %v111_v48 }
 0x166   :  { %v121_v52 = vsub.f32 %v119_v51, %v120_v50 }
 0x168   :  { %v152_v53 = vmul.f32 -10.0, %v121_v52 }
 0x16a   :  { %v124_v54 = vmul.f32 1.442695, %v152_v53 }
 0x16c   :  { %174 = vpow2.f32 %v124_v54 }
 0x176   :  { %v175_v55 = vpop.eup %174 }
 0x177   :  { %v126_v56 = vadd.f32 1.0, %v175_v55 }
 0x179   :  { %176 = vrcp.f32 %v126_v56 }
 0x183   :  { %v177_v57 = vpop.eup %176 }
 0x184   :  { %133 = vst.msk [vmem:[#allocation7] sm:$0xf] %vm131_vm1, %v177_v57 }
 0x185   :  { %233 = shalt.err (!%p230_p7)
}
 0x186   :  { %s234_s23 = scalar_lea.hbm %s317_s3, 64 }
 0x187   :  { %p235_p8 = scmp.ne.s32.totalorder %s317_s3, %s234_s23  ;;  %p238_p9 = scmp.lt.u32.totalorder %s234_s23, %s317_s3 }
 0x189   :  { %p240_p10 = pnand %p238_p9, %p235_p8 }
 0x18b   :  { %243 = shalt.err (!%p240_p10)
}
 0x18c   :  { %143 = dma.vmem_to_hbm [thread:$0]  %s141_s20, 64, %s317_s3, [#allocation4]  }
 0x18d   :  { %248 = dma.done.wait [#allocation4], 64  }
 0x18e   :  { %249 = vsyncadd [#allocation4], 4294967232 }
 0x18f   :  { %147 = vsyncpa [#allocation3], 1 }
 0x190   :  { %148 = vsyncpa [#allocation6], 1 }
 0x191   :  { %149 = vsyncpa [#allocation4], 1 }

</bundles_post_ra>
